<compile_context>
chip_gen: v5e
topology: v5e:2x2
jax: 0.10.0
libtpu: 0.0.40
codegen_flags: <defaults>
</compile_context>

<pallas_src>
import jax
import jax.numpy as jnp
from jax.experimental import pallas as pl
from jax.experimental.pallas import tpu as pltpu


# Packed parameter-slab layout (f32, shape (128, 64)). All row offsets are
# multiples of 8 so every in-kernel slice stays sublane-aligned; all column
# slices start at lane 0.
_W1 = (slice(0, 4), slice(0, 32))        # (4, 32)
_W2 = (slice(8, 40), slice(0, 64))       # (32, 64)
_W3D = (slice(40, 104), slice(0, 1))     # (64, 1)  = w3[:,1] - w3[:,0]
_B1 = (slice(104, 105), slice(0, 32))    # (1, 32)
_B2 = (slice(112, 113), slice(0, 64))    # (1, 64)
_B3D = (slice(120, 121), slice(0, 1))    # (1, 1)   = b3[1] - b3[0]
_PARAM_SLAB_SHAPE = (128, 64)

_VMEM_LIMIT_BYTES = 48 * 1024 * 1024     # v7x-safe (64 MiB physical), lifts v5e's 16 MiB default


def ppo_net_kernel(x_ref, p_ref, o_ref):
    x = x_ref[...]                                   # (TB, 4)

    w1 = p_ref[_W1]
    b1 = p_ref[_B1]
    w2 = p_ref[_W2]
    b2 = p_ref[_B2]
    w3d = p_ref[_W3D]
    b3d = p_ref[_B3D]

    # fc1 + ReLU
    h1 = jnp.dot(x, w1, preferred_element_type=jnp.float32) + b1
    h1 = jnp.maximum(h1, 0.0)                        # (TB, 32)

    # fc2 + ReLU
    h2 = jnp.dot(h1, w2, preferred_element_type=jnp.float32) + b2
    h2 = jnp.maximum(h2, 0.0)                        # (TB, 64)

    # Logit difference directly (precomputed difference column), then the exact
    # 2-class softmax as a sigmoid in tanh form: one EUP transcendental, no
    # cross-lane reductions, rows sum to 1 by construction.
    d = jnp.dot(h2, w3d, preferred_element_type=jnp.float32) + b3d   # (TB, 1)
    p1 = 0.5 * (1.0 + jnp.tanh(0.5 * d))             # sigmoid(d), exact identity
    p0 = 1.0 - p1
    lane = jax.lax.broadcasted_iota(jnp.int32, o_ref.shape, 1)
    o_ref[...] = jnp.where(lane == 0, p0, p1).astype(o_ref.dtype)    # (TB, 2)


def _round_up(n, m):
    return ((n + m - 1) // m) * m


def ppo_net_forward(x, packed_params, *, block_b=4096):
    B = x.shape[0]

    # ---- Tile selection -----------------------------------------------------
    # Always take the tiled, pipelined path: round the batch up to the sublane
    # multiple, pick an 8-aligned tile, and (when there is enough work) keep at
    # least two grid steps so both v7x TensorCores get a tile.
    b8 = _round_up(max(B, 1), 8)
    block_b = _round_up(block_b, 8)
    if b8 <= 8:
        tb = 8
    else:
        half = _round_up(b8 // 2, 8)     # >= 2 tiles when the batch allows it
        tb = max(8, min(block_b, half))

    b_pad = _round_up(b8, tb)
    if b_pad != B:
        x = jnp.pad(x, ((0, b_pad - B), (0, 0)))
    grid = (b_pad // tb,)

    per_row_flops = 2 * (4 * 32 + 32 * 64 + 64 * 1)
    cost = pl.CostEstimate(
        flops=per_row_flops * b_pad,
        transcendentals=b_pad,                                           # one tanh per row
        bytes_accessed=b_pad * 4 * 4 + 128 * 64 * 4 + b_pad * 2 * 4,     # x + params + out
    )

    out = pl.pallas_call(
        ppo_net_kernel,
        out_shape=jax.ShapeDtypeStruct((b_pad, 2), jnp.float32),
        grid=grid,
        in_specs=[
            # x: streamed one batch tile per grid step (double-buffered DMA).
            pl.BlockSpec((tb, 4), lambda i: (i, 0)),
            # params: constant block index -> single DMA, VMEM-resident.
            pl.BlockSpec(_PARAM_SLAB_SHAPE, lambda i: (0, 0)),
        ],
        out_specs=pl.BlockSpec((tb, 2), lambda i: (i, 0)),
        compiler_params=pltpu.CompilerParams(
            dimension_semantics=("parallel",),        # megacore sharding on v7x
            vmem_limit_bytes=_VMEM_LIMIT_BYTES,       # allow the big batch tiles
        ),
        cost_estimate=cost,
    )(x, packed_params)

    return out[:B]


def init_params(key):
    # PyTorch: weight.data.normal_(0, 0.1); bias keeps the default
    # U(-1/sqrt(fan_in), 1/sqrt(fan_in)) init.
    # Weights stored transposed: (in_features, out_features); biases (1, out).
    ks = jax.random.split(key, 6)

    def linear(kw, kb, fan_in, fan_out):
        w = 0.1 * jax.random.normal(kw, (fan_in, fan_out), dtype=jnp.float32)
        bound = 1.0 / jnp.sqrt(jnp.float32(fan_in))
        b = jax.random.uniform(kb, (1, fan_out), dtype=jnp.float32,
                               minval=-bound, maxval=bound)
        return w, b

    w1, b1 = linear(ks[0], ks[1], 4, 32)
    w2, b2 = linear(ks[2], ks[3], 32, 64)
    w3, b3 = linear(ks[4], ks[5], 64, 2)
    return (w1, b1, w2, b2, w3, b3)


def pack_params(params):
    """Pack weights/biases into one (128, 64) f32 slab; the out layer is stored
    as the precomputed logit-difference column (exact for a 2-class softmax)."""
    w1, b1, w2, b2, w3, b3 = params
    w3d = (w3[:, 1] - w3[:, 0]).reshape(64, 1)
    b3d = (b3[:, 1] - b3[:, 0]).reshape(1, 1)
    p = jnp.zeros(_PARAM_SLAB_SHAPE, jnp.float32)
    p = p.at[_W1].set(w1)
    p = p.at[_W2].set(w2)
    p = p.at[_W3D].set(w3d)
    p = p.at[_B1].set(b1)
    p = p.at[_B2].set(b2)
    p = p.at[_B3D].set(b3d)
    return p


def reference_forward(x, params):
    w1, b1, w2, b2, w3, b3 = params
    h1 = jnp.maximum(x @ w1 + b1, 0.0)
    h2 = jnp.maximum(h1 @ w2 + b2, 0.0)
    logits = h2 @ w3 + b3
    return jax.nn.softmax(logits, axis=-1)


if __name__ == "__main__":
    key = jax.random.PRNGKey(0)
    k_params, k_x = jax.random.split(key)

    params = init_params(k_params)
    packed = pack_params(params)

    # Small deterministic input consistent with the module: batch=8, state_dim=4.
    x = jax.random.normal(k_x, (8, 4), dtype=jnp.float32)
    out = jax.block_until_ready(ppo_net_forward(x, packed))
    ref = reference_forward(x, params)
    assert out.shape == (8, 2)
    assert jnp.allclose(out, ref, atol=1e-5, rtol=1e-5), "mismatch vs JAX reference"
    assert jnp.allclose(jnp.sum(out, axis=-1), 1.0, atol=1e-5), "softmax rows must sum to 1"

    # Non-multiple-of-8 batch exercises the padding path (no monolithic block).
    xo = jax.random.normal(jax.random.PRNGKey(2), (1000, 4), dtype=jnp.float32)
    outo = jax.block_until_ready(ppo_net_forward(xo, packed))
    refo = reference_forward(xo, params)
    assert outo.shape == (1000, 2)
    assert jnp.allclose(outo, refo, atol=1e-5, rtol=1e-5), "mismatch on padded odd batch"

    # Larger batch exercises the multi-tile, two-TensorCore grid path.
    xb = jax.random.normal(jax.random.PRNGKey(1), (8192, 4), dtype=jnp.float32)
    outb = jax.block_until_ready(ppo_net_forward(xb, packed))
    refb = reference_forward(xb, params)
    assert jnp.allclose(outb, refb, atol=1e-5, rtol=1e-5), "mismatch on tiled batch"

    print("KERNEL_OK")
</pallas_src>

<mosaic_0001>
module attributes {stable_mosaic.version = 11 : i64} {
  func.func @ppo_net_kernel(%arg0: i32, %arg1: memref<8x4xf32, #tpu.memory_space<vmem>>, %arg2: memref<128x64xf32, #tpu.memory_space<vmem>>, %arg3: memref<8x2xf32, #tpu.memory_space<vmem>>) attributes {dimension_semantics = [#tpu.dimension_semantics<parallel>], iteration_bounds = array<i64: 1>, scalar_prefetch = 0 : i64, scratch_operands = 0 : i64, tpu.core_type = #tpu.core_type<tc>, window_params = [{transform_indices = @transform_0, window_bounds = array<i64: 8, 4>}, {pipeline_mode = #tpu.pipeline_mode<synchronous>, transform_indices = @transform_1, window_bounds = array<i64: 128, 64>}, {transform_indices = @transform_2, window_bounds = array<i64: 8, 2>}]} {
    %c0 = arith.constant 0 : index
    %c0_0 = arith.constant 0 : index
    %0 = vector.load %arg1[%c0, %c0_0] : memref<8x4xf32, #tpu.memory_space<vmem>>, vector<8x4xf32>
    %c0_1 = arith.constant 0 : index
    %c0_2 = arith.constant 0 : index
    %1 = vector.load %arg2[%c0_1, %c0_2] : memref<128x64xf32, #tpu.memory_space<vmem>>, vector<4x32xf32>
    %c104 = arith.constant 104 : index
    %c0_3 = arith.constant 0 : index
    %2 = vector.load %arg2[%c104, %c0_3] : memref<128x64xf32, #tpu.memory_space<vmem>>, vector<1x32xf32>
    %c8 = arith.constant 8 : index
    %c0_4 = arith.constant 0 : index
    %3 = vector.load %arg2[%c8, %c0_4] : memref<128x64xf32, #tpu.memory_space<vmem>>, vector<32x64xf32>
    %c112 = arith.constant 112 : index
    %c0_5 = arith.constant 0 : index
    %4 = vector.load %arg2[%c112, %c0_5] : memref<128x64xf32, #tpu.memory_space<vmem>>, vector<1x64xf32>
    %c40 = arith.constant 40 : index
    %c0_6 = arith.constant 0 : index
    %5 = vector.load %arg2[%c40, %c0_6] : memref<128x64xf32, #tpu.memory_space<vmem>>, vector<64x1xf32>
    %c120 = arith.constant 120 : index
    %c0_7 = arith.constant 0 : index
    %6 = vector.load %arg2[%c120, %c0_7] : memref<128x64xf32, #tpu.memory_space<vmem>>, vector<1x1xf32>
    %cst = arith.constant dense<0.000000e+00> : vector<8x32xf32>
    %7 = tpu.matmul %0, %1, %cst {dimension_numbers = #tpu.dot_dimension_numbers<[1], [0], [0], [1], [0, 0, 1, 1], [], []>} : vector<8x4xf32>, vector<4x32xf32>, vector<8x32xf32> -> vector<8x32xf32>
    %8 = vector.broadcast %2 : vector<1x32xf32> to vector<8x32xf32>
    %9 = arith.addf %7, %8 : vector<8x32xf32>
    %cst_8 = arith.constant 0.000000e+00 : f32
    %10 = vector.broadcast %cst_8 : f32 to vector<8x32xf32>
    %11 = arith.maximumf %9, %10 : vector<8x32xf32>
    %cst_9 = arith.constant dense<0.000000e+00> : vector<8x64xf32>
    %12 = tpu.matmul %11, %3, %cst_9 {dimension_numbers = #tpu.dot_dimension_numbers<[1], [0], [0], [1], [0, 0, 1, 1], [], []>} : vector<8x32xf32>, vector<32x64xf32>, vector<8x64xf32> -> vector<8x64xf32>
    %13 = vector.broadcast %4 : vector<1x64xf32> to vector<8x64xf32>
    %14 = arith.addf %12, %13 : vector<8x64xf32>
    %cst_10 = arith.constant 0.000000e+00 : f32
    %15 = vector.broadcast %cst_10 : f32 to vector<8x64xf32>
    %16 = arith.maximumf %14, %15 : vector<8x64xf32>
    %cst_11 = arith.constant dense<0.000000e+00> : vector<8x1xf32>
    %17 = tpu.matmul %16, %5, %cst_11 {dimension_numbers = #tpu.dot_dimension_numbers<[1], [0], [0], [1], [0, 0, 1, 1], [], []>} : vector<8x64xf32>, vector<64x1xf32>, vector<8x1xf32> -> vector<8x1xf32>
    %18 = vector.broadcast %6 : vector<1x1xf32> to vector<8x1xf32>
    %19 = arith.addf %17, %18 : vector<8x1xf32>
    %cst_12 = arith.constant 5.000000e-01 : f32
    %20 = vector.broadcast %cst_12 : f32 to vector<8x1xf32>
    %21 = arith.mulf %20, %19 : vector<8x1xf32>
    %22 = math.tanh %21 : vector<8x1xf32>
    %cst_13 = arith.constant 1.000000e+00 : f32
    %23 = vector.broadcast %cst_13 : f32 to vector<8x1xf32>
    %24 = arith.addf %23, %22 : vector<8x1xf32>
    %cst_14 = arith.constant 5.000000e-01 : f32
    %25 = vector.broadcast %cst_14 : f32 to vector<8x1xf32>
    %26 = arith.mulf %25, %24 : vector<8x1xf32>
    %cst_15 = arith.constant 1.000000e+00 : f32
    %27 = vector.broadcast %cst_15 : f32 to vector<8x1xf32>
    %28 = arith.subf %27, %26 : vector<8x1xf32>
    %29 = tpu.iota {dimensions = array<i32: 1>} : vector<8x2xi32>
    %c0_i32 = arith.constant 0 : i32
    %30 = vector.broadcast %c0_i32 : i32 to vector<8x2xi32>
    %31 = arith.cmpi eq, %29, %30 : vector<8x2xi32>
    %32 = vector.shape_cast %28 : vector<8x1xf32> to vector<8x1xf32>
    %33 = vector.broadcast %32 : vector<8x1xf32> to vector<8x2xf32>
    %34 = vector.shape_cast %26 : vector<8x1xf32> to vector<8x1xf32>
    %35 = vector.broadcast %34 : vector<8x1xf32> to vector<8x2xf32>
    %36 = arith.select %31, %33, %35 : vector<8x2xi1>, vector<8x2xf32>
    %c0_16 = arith.constant 0 : index
    %c0_17 = arith.constant 0 : index
    %37 = vector.load %arg3[%c0_16, %c0_17] : memref<8x2xf32, #tpu.memory_space<vmem>>, vector<8x2xf32>
    tpu.vector_store %arg3[%c0_16, %c0_17], %36 {strides = array<i32>} : memref<8x2xf32, #tpu.memory_space<vmem>>, vector<8x2xf32>,
    return
  }
  func.func @transform_0(%arg0: i32) -> (i32, i32) {
    %c0_i32 = arith.constant 0 : i32
    %c0_i32_0 = arith.constant 0 : i32
    return %arg0, %c0_i32 : i32, i32
  }
  func.func @transform_1(%arg0: i32) -> (i32, i32) {
    %c0_i32 = arith.constant 0 : i32
    %c0_i32_0 = arith.constant 0 : i32
    %c0_i32_1 = arith.constant 0 : i32
    return %c0_i32, %c0_i32_0 : i32, i32
  }
  func.func @transform_2(%arg0: i32) -> (i32, i32) {
    %c0_i32 = arith.constant 0 : i32
    %c0_i32_0 = arith.constant 0 : i32
    return %arg0, %c0_i32 : i32, i32
  }
}

</mosaic_0001>

<bundles_post_ra>
// kernel: tpu_custom_call.1
= control target key start
LH: loop header
LB: loop body
LE: loop exit
PB: predicated region body
PF: predicated region fallthrough
CT: control target
= control target key end

     0   :  { %vm33_vm0 = vcmask 1043456   ;;  %vm29_vm1 = vcmask 31744   ;;  %vm59_vm2 = vcmask 261120   ;;  %vm85_vm3 = vcmask 523264   ;;  %s215_s1 = inlined_call_operand.vmem [shape: f32[128,64], index: 1, kind: input, shape index: {}]   ;;  %s216_s0 = inlined_call_operand.vmem [shape: f32[8,4], index: 0, kind: input, shape index: {}]   ;;  %s217_s2 = inlined_call_operand.vmem [shape: f32[8,2], index: 2, kind: output, shape index: {}]  }
   0x1   :  { %v12_v0 = vld [vmem:[%s215_s1] sm:$0xf]  ;;  %v16_v3 = vld [vmem:[%s215_s1 + $0x18] sm:$0xff]  ;;  %v15_v4 = vld [vmem:[%s215_s1 + $0x10] sm:$0xff]  ;;  %v145_v22 = vmov 0   ;;  %v114_v31 = vlaneseq  ;;  %vm128_vm5 = vcmask 15360  }
   0x2   :  { %v11_v1 = vld [vmem:[%s216_s0] sm:$0xff]  ;;  %134 = vmatpush.msk.msra.mxu0 %vm33_vm0, %v12_v0  ;;  %v14_v5 = vld [vmem:[%s215_s1 + $0x8] sm:$0xff]  ;;  %v25_v7 = vld [vmem:[%s215_s1 + $0x58] sm:$0xff]  ;;  %139 = vset.pattern.permute.xlu0 %v145_v22 }
   0x3   :  { %v17_v2 = vld [vmem:[%s215_s1 + $0x20] sm:$0xff]  ;;  %135 = vmatmul.msk.f32.vlgmr.msra.gmra.mxu0 %vm29_vm1, %v11_v1  ;;  %v24_v8 = vld [vmem:[%s215_s1 + $0x50] sm:$0xff]  ;;  %v23_v9 = vld [vmem:[%s215_s1 + $0x48] sm:$0xff]  ;;  %v115_v33 = vand.u32 127, %v114_v31 }
   0x4   :  { %75 = vmatpush.msra.mxu1 %v17_v2  ;;  %v26_v6 = vld [vmem:[%s215_s1 + $0x60] sm:$0xff]  ;;  %v140_v11 = vld [vmem:[%s215_s1 + $0x68] ss:$0 sm:$0xff]  ;;  %v21_v15 = vld [vmem:[%s215_s1 + $0x38] sm:$0xff] }
   0x5   :  { %97 = vmatpush.msra.mxu2 %v26_v6  ;;  %v22_v10 = vld [vmem:[%s215_s1 + $0x40] sm:$0xff]  ;;  %v20_v16 = vld [vmem:[%s215_s1 + $0x30] sm:$0xff]  ;;  %v19_v17 = vld [vmem:[%s215_s1 + $0x28] sm:$0xff]  ;;  %vm116_vm4 = vcmp.eq.s32.totalorder %v115_v33, 0 }
   0x6   :  { %76 = vmatpush.msra.mxu1 %v16_v3  ;;  %v141_v18 = vld [vmem:[%s215_s1 + $0x70] ss:$0 sm:$0xff]  ;;  %v142_v23 = vld [vmem:[%s215_s1 + $0x78] ss:$0 sm:$0xff] }
   0x7   :  { %98 = vmatpush.msra.mxu2 %v25_v7 }
   0x8   :  { %77 = vmatpush.msra.mxu1 %v15_v4 }
   0x9   :  { %99 = vmatpush.msra.mxu2 %v24_v8 }
   0xa   :  { %78 = vmatpush.msra.mxu1 %v14_v5 }
   0xb   :  { %100 = vmatpush.msra.mxu2 %v23_v9 }
   0xd   :  { %101 = vmatpush.msra.mxu2 %v22_v10 }
   0xf   :  { %102 = vmatpush.msra.mxu2 %v21_v15 }
  0x11   :  { %103 = vmatpush.msra.mxu2 %v20_v16 }
  0x13   :  { %104 = vmatpush.msra.mxu2 %v19_v17 }
  0x80   :  { %v54_v12 = vpop.f32.mrf.mxu0 }
  0x81   :  { %v55_v13 = vadd.f32 %v140_v11, %v54_v12 }
  0x83   :  { %v57_v14 = vmax.f32 %v55_v13, 0.0 }
  0x85   :  { %136 = vmatmul.msk.f32.vlgmr.msra.gmra.mxu1 %vm59_vm2, %v57_v14 }
 0x102   :  { %v80_v19 = vpop.f32.mrf.mxu1 }
 0x103   :  { %v81_v20 = vadd.f32 %v141_v18, %v80_v19 }
 0x105   :  { %v83_v21 = vmax.f32 %v81_v20, 0.0 }
 0x107   :  { %137 = vmatmul.msk.f32.vlgmr.msra.gmra.mxu2 %vm85_vm3, %v83_v21 }
 0x18a   :  { %v106_v24 = vpop.f32.mrf.mxu2 }
 0x18b   :  { %v107_v25 = vadd.f32 %v142_v23, %v106_v24 }
 0x18d   :  { %v109_v26 = vmul.f32 0.5, %v107_v25 }
 0x18f   :  { %143 = vtanh.f32 %v109_v26 }
 0x195   :  { %v144_v27 = vpop.eup %143 }
 0x196   :  { %v111_v28 = vadd.f32 1.0, %v144_v27 }
 0x198   :  { %v112_v29 = vmul.f32 0.5, %v111_v28 }
 0x19a   :  { %v113_v30 = vsub.f32 1.0, %v112_v29 }
 0x19c   :  { %119 = vperm.xlu0 %139, %v113_v30  }
 0x1a4   :  { %124 = vperm.xlu0 %139, %v112_v29  }
 0x20e   :  { %v120_v32 = vpop.permute.xlu0 %119 }
 0x216   :  { %v125_v34 = vpop.permute.xlu0 %124 }
 0x217   :  { %v127_v35 = vsel %vm116_vm4, %v120_v32, %v125_v34 }
 0x218   :  { %129 = vst.msk [vmem:[%s217_s2] sm:$0xff] %vm128_vm5, %v127_v35 }

</bundles_post_ra>
